<compile_context>
chip_gen: v6e
topology: v6e:2x2x1
jax: 0.10.0
libtpu: 0.0.40
codegen_flags: <defaults>
</compile_context>

<pallas_src>
import math
import numpy as np

import jax
import jax.numpy as jnp
from jax.experimental import pallas as pl
from jax.experimental.pallas import tpu as pltpu


# ----------------------------------------------------------------------------
# Host-side glue: real spherical-harmonic basis + quadrature (plain numpy).
# ----------------------------------------------------------------------------
def real_sph_harmonics(L, n):
    """Real SH basis sampled on an n x n equiangular grid.

    Returns:
      Y        : (K, n*n) synthesis basis, K = L*L
      qw       : (n*n,)   quadrature weights (sin(theta) * cell area)
      degree_of: (K,)     degree l of each basis function
    """
    theta = (np.arange(n) + 0.5) * np.pi / n          # colatitude
    phi = np.arange(n) * 2.0 * np.pi / n              # longitude
    ct, st = np.cos(theta), np.sin(theta)

    # Associated Legendre P_l^m(cos theta), l,m < L (Condon-Shortley phase).
    P = np.zeros((L, L, n), dtype=np.float64)
    P[0, 0] = 1.0
    for m in range(1, L):
        P[m, m] = -(2 * m - 1) * st * P[m - 1, m - 1]
    for m in range(L):
        if m + 1 < L:
            P[m + 1, m] = (2 * m + 1) * ct * P[m, m]
        for l in range(m + 2, L):
            P[l, m] = ((2 * l - 1) * ct * P[l - 1, m]
                       - (l + m - 1) * P[l - 2, m]) / (l - m)

    K = L * L
    Y = np.zeros((K, n, n), dtype=np.float64)
    degree_of = np.zeros((K,), dtype=np.int64)
    k = 0
    for l in range(L):
        for m in range(-l, l + 1):
            am = abs(m)
            norm = math.sqrt((2 * l + 1) / (4 * math.pi)
                             * math.factorial(l - am) / math.factorial(l + am))
            if m == 0:
                ylm = norm * P[l, 0][:, None] * np.ones((1, n))
            elif m > 0:
                ylm = math.sqrt(2.0) * norm * P[l, am][:, None] * np.cos(am * phi)[None, :]
            else:
                ylm = math.sqrt(2.0) * norm * P[l, am][:, None] * np.sin(am * phi)[None, :]
            Y[k] = ylm
            degree_of[k] = l
            k += 1

    qw = (st[:, None] * (np.pi / n) * (2.0 * np.pi / n)
          * np.ones((1, n))).reshape(-1)
    return Y.reshape(K, n * n), qw, degree_of


# ----------------------------------------------------------------------------
# Host-side operand preparation: fold quadrature + convolution-theorem scale +
# inverse SHT into a single P x P operator (valid because the degree axis of
# the weights has size 1 and broadcasts over all degrees).
# ----------------------------------------------------------------------------
def prepare_operands(x, weights, bias, Y, qw, degree_of, compute_dtype):
    B, n, _, Cin = x.shape
    P = n * n
    Cout = weights.shape[-1]
    # Fusion of Y^T @ A is only exact for a single (broadcast) degree slot.
    assert weights.shape[1] == 1, "fused operator requires a single degree slot"

    scale = 2.0 * np.pi * np.sqrt(4.0 * np.pi / (2.0 * np.asarray(degree_of, np.float64) + 1.0))
    A_s = (Y * qw[None, :]) * scale[:, None]            # (K, P) analysis (quadrature + scale)
    Mt = A_s.T @ Y                                      # (P, P); Mt[q,p] = (Y^T @ A_s)[p,q]

    # Channel-first, lane-dense layout (P on lanes) — plumbing done in XLA.
    x_cf = jnp.transpose(jnp.reshape(jnp.asarray(x, jnp.float32), (B, P, Cin)), (0, 2, 1))
    Wt = jnp.asarray(weights[:, 0, :], jnp.float32).T   # (Cout, Cin)
    bias_cf = jnp.broadcast_to(jnp.reshape(jnp.asarray(bias, jnp.float32), (Cout, 1)), (Cout, P))

    return (x_cf.astype(compute_dtype),
            Wt.astype(compute_dtype),
            jnp.asarray(Mt, compute_dtype),
            jnp.asarray(bias_cf, jnp.float32))


# ----------------------------------------------------------------------------
# Pallas kernel: channel mix -> fused (inverse-SHT @ analysis) matmul -> bias.
# ----------------------------------------------------------------------------
def sphconv_kernel(x_ref, wt_ref, mt_ref, b_ref, o_ref):
    # x_ref : (Bt, Cin, P)   wt_ref : (Cout, Cin)   mt_ref : (P, P)
    # b_ref : (Cout, P)      o_ref  : (Bt, Cout, P)
    Bt, Cin, P = x_ref.shape
    Cout = wt_ref.shape[0]

    x = x_ref[...]
    wt_b = jnp.broadcast_to(wt_ref[...][None, :, :], (Bt, Cout, Cin))
    # Per-batch channel mix (tiny contraction over Cin), lane-dense output.
    xw = jnp.einsum("bdc,bcq->bdq", wt_b, x,
                    preferred_element_type=jnp.float32).astype(x.dtype)     # (Bt, Cout, P)
    # One deep MXU matmul against the fused P x P spectral operator.
    y = jnp.dot(xw.reshape(Bt * Cout, P), mt_ref[...],
                preferred_element_type=jnp.float32)                         # (Bt*Cout, P)
    o_ref[...] = (y.reshape(Bt, Cout, P) + b_ref[...][None, :, :]).astype(o_ref.dtype)


def sph_conv_pallas(x, weights, bias, Y, qw, degree_of, *,
                    compute_dtype=jnp.float32, batch_tile=None):
    B, n, _, Cin = x.shape
    P = n * n
    Cout = weights.shape[-1]

    x_cf, Wt, Mt, bias_cf = prepare_operands(x, weights, bias, Y, qw, degree_of, compute_dtype)

    # Batch tile: whole batch per grid step for small B (amortizes grid overhead).
    Bt = batch_tile if batch_tile is not None else min(B, 16)
    n_tiles = -(-B // Bt)
    Bp = n_tiles * Bt
    if Bp != B:
        x_cf = jnp.concatenate(
            [x_cf, jnp.zeros((Bp - B, Cin, P), x_cf.dtype)], axis=0)

    itemsize = int(np.dtype(x_cf.dtype).itemsize)
    flops = int(2 * Bp * Cout * Cin * P + 2 * Bp * Cout * P * P)
    bytes_accessed = int(Bp * Cin * P * itemsize          # x
                         + P * P * itemsize               # fused operator
                         + Cout * Cin * itemsize          # weights
                         + Cout * P * 4                   # bias
                         + Bp * Cout * P * 4)             # output

    out_cf = pl.pallas_call(
        sphconv_kernel,
        out_shape=jax.ShapeDtypeStruct((Bp, Cout, P), jnp.float32),
        grid=(n_tiles,),
        in_specs=[
            pl.BlockSpec((Bt, Cin, P), lambda i: (i, 0, 0)),
            pl.BlockSpec((Cout, Cin), lambda i: (0, 0)),
            pl.BlockSpec((P, P), lambda i: (0, 0)),
            pl.BlockSpec((Cout, P), lambda i: (0, 0)),
        ],
        out_specs=pl.BlockSpec((Bt, Cout, P), lambda i: (i, 0, 0)),
        compiler_params=pltpu.CompilerParams(
            dimension_semantics=("parallel",),
            vmem_limit_bytes=32 * 1024 * 1024),
        cost_estimate=pl.CostEstimate(flops=flops, transcendentals=0,
                                      bytes_accessed=bytes_accessed),
    )(x_cf, Wt, Mt, bias_cf)

    # Back to NHWC (layout plumbing in the wrapper).
    out = jnp.transpose(out_cf[:B], (0, 2, 1)).reshape(B, n, n, Cout)
    return out


# ----------------------------------------------------------------------------
# Pure-JAX reference: the original UNFUSED 3-matmul chain (independent path).
# ----------------------------------------------------------------------------
def sph_conv_reference(x, weights, bias, Y, qw, degree_of):
    B, n, _, Cin = x.shape
    P = n * n
    Cout = weights.shape[-1]
    scale = 2.0 * np.pi * np.sqrt(4.0 * np.pi / (2.0 * np.asarray(degree_of, np.float64) + 1.0))
    A_s = jnp.asarray((Y * qw[None, :]) * scale[:, None], jnp.float32)    # (K, P)
    Yt = jnp.asarray(Y.T, jnp.float32)                                    # (P, K)
    x_flat = jnp.reshape(jnp.asarray(x, jnp.float32), (B, P, Cin))
    W0 = jnp.asarray(weights[:, 0, :], jnp.float32)                       # (Cin, Cout)
    cx = jnp.einsum("kp,bpc->bkc", A_s, x_flat)
    cy = jnp.einsum("bkc,cd->bkd", cx, W0)
    y = jnp.einsum("pk,bkd->bpd", Yt, cy) + jnp.reshape(jnp.asarray(bias, jnp.float32), (1, 1, Cout))
    return jnp.reshape(y, (B, n, n, Cout))


# ----------------------------------------------------------------------------
if __name__ == "__main__":
    key = jax.random.PRNGKey(0)
    kx, kw = jax.random.split(key)

    # Small demo shapes.
    B, n, C_in, C_out = 2, 16, 4, 8          # x: (B, n, n, C_in) NHWC

    # Parameter init exactly as in SphConv.__init__ (n hard-coded to 2 there).
    n_init = 2
    std = 2.0 / (2.0 * np.pi * np.sqrt((n_init // 2) * C_in))
    weights = jax.random.normal(kw, (C_in, n_init // 2, C_out), jnp.float32) * std
    bias = jnp.zeros((1, 1, 1, C_out), jnp.float32)

    x = jax.random.normal(kx, (B, n, n, C_in), jnp.float32)

    # Precompute SH basis / quadrature for the input bandwidth L = n // 2.
    Y, qw, degree_of = real_sph_harmonics(n // 2, n)

    ref = jax.block_until_ready(sph_conv_reference(x, weights, bias, Y, qw, degree_of))

    # f32 compute path.
    out = jax.block_until_ready(sph_conv_pallas(x, weights, bias, Y, qw, degree_of))
    assert out.shape == (B, n, n, C_out), out.shape
    np.testing.assert_allclose(np.asarray(out), np.asarray(ref), rtol=1e-4, atol=1e-4)

    # bf16 compute path (f32 accumulation) — looser tolerance.
    out_bf16 = jax.block_until_ready(
        sph_conv_pallas(x, weights, bias, Y, qw, degree_of, compute_dtype=jnp.bfloat16))
    np.testing.assert_allclose(np.asarray(out_bf16), np.asarray(ref), rtol=5e-2, atol=1e-1)

    print("KERNEL_OK")
</pallas_src>

<mosaic_0001>
module attributes {stable_mosaic.version = 11 : i64} {
  func.func @sphconv_kernel(%arg0: i32, %arg1: memref<2x4x256xf32, #tpu.memory_space<vmem>>, %arg2: memref<8x4xf32, #tpu.memory_space<vmem>>, %arg3: memref<256x256xf32, #tpu.memory_space<vmem>>, %arg4: memref<8x256xf32, #tpu.memory_space<vmem>>, %arg5: memref<2x8x256xf32, #tpu.memory_space<vmem>>) attributes {dimension_semantics = [#tpu.dimension_semantics<parallel>], iteration_bounds = array<i64: 1>, scalar_prefetch = 0 : i64, scratch_operands = 0 : i64, tpu.core_type = #tpu.core_type<tc>, window_params = [{transform_indices = @transform_0, window_bounds = array<i64: 2, 4, 256>}, {pipeline_mode = #tpu.pipeline_mode<synchronous>, transform_indices = @transform_1, window_bounds = array<i64: 8, 4>}, {pipeline_mode = #tpu.pipeline_mode<synchronous>, transform_indices = @transform_2, window_bounds = array<i64: 256, 256>}, {pipeline_mode = #tpu.pipeline_mode<synchronous>, transform_indices = @transform_3, window_bounds = array<i64: 8, 256>}, {transform_indices = @transform_4, window_bounds = array<i64: 2, 8, 256>}]} {
    %c0 = arith.constant 0 : index
    %c0_0 = arith.constant 0 : index
    %c0_1 = arith.constant 0 : index
    %0 = vector.load %arg1[%c0, %c0_0, %c0_1] : memref<2x4x256xf32, #tpu.memory_space<vmem>>, vector<2x4x256xf32>
    %c0_2 = arith.constant 0 : index
    %c0_3 = arith.constant 0 : index
    %1 = vector.load %arg2[%c0_2, %c0_3] : memref<8x4xf32, #tpu.memory_space<vmem>>, vector<8x4xf32>
    %2 = vector.shape_cast %1 : vector<8x4xf32> to vector<1x8x4xf32>
    %3 = vector.shape_cast %2 : vector<1x8x4xf32> to vector<1x8x4xf32>
    %4 = vector.broadcast %3 : vector<1x8x4xf32> to vector<2x8x4xf32>
    "tpu.trace_start"() <{level = 10 : i32, message = "bdc,bcq->bdq"}> : () -> ()
    %cst = arith.constant dense<0.000000e+00> : vector<2x8x256xf32>
    %5 = tpu.matmul %4, %0, %cst {dimension_numbers = #tpu.dot_dimension_numbers<[2], [1], [1], [2], [0, 0, 0, 1, 1, 2], [0], [0]>} : vector<2x8x4xf32>, vector<2x4x256xf32>, vector<2x8x256xf32> -> vector<2x8x256xf32>
    "tpu.trace_stop"() : () -> ()
    %6 = vector.shape_cast %5 : vector<2x8x256xf32> to vector<16x256xf32>
    %c0_4 = arith.constant 0 : index
    %c0_5 = arith.constant 0 : index
    %7 = vector.load %arg3[%c0_4, %c0_5] : memref<256x256xf32, #tpu.memory_space<vmem>>, vector<256x256xf32>
    %cst_6 = arith.constant dense<0.000000e+00> : vector<16x256xf32>
    %8 = tpu.matmul %6, %7, %cst_6 {dimension_numbers = #tpu.dot_dimension_numbers<[1], [0], [0], [1], [0, 0, 1, 1], [], []>} : vector<16x256xf32>, vector<256x256xf32>, vector<16x256xf32> -> vector<16x256xf32>
    %9 = vector.shape_cast %8 : vector<16x256xf32> to vector<2x8x256xf32>
    %c0_7 = arith.constant 0 : index
    %c0_8 = arith.constant 0 : index
    %10 = vector.load %arg4[%c0_7, %c0_8] : memref<8x256xf32, #tpu.memory_space<vmem>>, vector<8x256xf32>
    %11 = vector.shape_cast %10 : vector<8x256xf32> to vector<1x8x256xf32>
    %12 = vector.broadcast %11 : vector<1x8x256xf32> to vector<2x8x256xf32>
    %13 = arith.addf %9, %12 : vector<2x8x256xf32>
    %c0_9 = arith.constant 0 : index
    %c0_10 = arith.constant 0 : index
    %c0_11 = arith.constant 0 : index
    %14 = vector.load %arg5[%c0_9, %c0_10, %c0_11] : memref<2x8x256xf32, #tpu.memory_space<vmem>>, vector<2x8x256xf32>
    tpu.vector_store %arg5[%c0_9, %c0_10, %c0_11], %13 {strides = array<i32>} : memref<2x8x256xf32, #tpu.memory_space<vmem>>, vector<2x8x256xf32>,
    return
  }
  func.func @transform_0(%arg0: i32) -> (i32, i32, i32) {
    %c0_i32 = arith.constant 0 : i32
    %c0_i32_0 = arith.constant 0 : i32
    %c0_i32_1 = arith.constant 0 : i32
    return %arg0, %c0_i32, %c0_i32_0 : i32, i32, i32
  }
  func.func @transform_1(%arg0: i32) -> (i32, i32) {
    %c0_i32 = arith.constant 0 : i32
    %c0_i32_0 = arith.constant 0 : i32
    %c0_i32_1 = arith.constant 0 : i32
    return %c0_i32, %c0_i32_0 : i32, i32
  }
  func.func @transform_2(%arg0: i32) -> (i32, i32) {
    %c0_i32 = arith.constant 0 : i32
    %c0_i32_0 = arith.constant 0 : i32
    %c0_i32_1 = arith.constant 0 : i32
    return %c0_i32, %c0_i32_0 : i32, i32
  }
  func.func @transform_3(%arg0: i32) -> (i32, i32) {
    %c0_i32 = arith.constant 0 : i32
    %c0_i32_0 = arith.constant 0 : i32
    %c0_i32_1 = arith.constant 0 : i32
    return %c0_i32, %c0_i32_0 : i32, i32
  }
  func.func @transform_4(%arg0: i32) -> (i32, i32, i32) {
    %c0_i32 = arith.constant 0 : i32
    %c0_i32_0 = arith.constant 0 : i32
    %c0_i32_1 = arith.constant 0 : i32
    return %arg0, %c0_i32, %c0_i32_0 : i32, i32, i32
  }
}

</mosaic_0001>

<bundles_post_ra>
// kernel: tpu_custom_call.1
= control target key start
LH: loop header
LB: loop body
LE: loop exit
PB: predicated region body
PF: predicated region fallthrough
CT: control target
= control target key end

     0   :  { %9 = vsyncpa [#allocation3], 0  ;;  %s580_s0 = inlined_call_operand.hbm [shape: f32[2,4,256], index: 0, kind: input, shape index: {}]   ;;  %s581_s1 = inlined_call_operand.vmem [shape: f32[8,4], index: 1, kind: input, shape index: {}]   ;;  %s582_s2 = inlined_call_operand.hbm [shape: f32[256,256], index: 2, kind: input, shape index: {}]   ;;  %s583_s3 = inlined_call_operand.vmem [shape: f32[8,256], index: 3, kind: input, shape index: {}]   ;;  %s584_s4 = inlined_call_operand.hbm [shape: f32[2,8,256], index: 4, kind: output, shape index: {}]  }
   0x1   :  { %10 = vsyncpa [#allocation6], 0 }
   0x2   :  { %11 = vsyncpa [#allocation4], 0  ;;  %s523_s15 = smov [#allocation2]  }
   0x3   :  { %s17_s16 = sshll.u32 %s523_s15, 4  ;;  %s18_s16 = int_to_ptr.vmem [resolvable:$true] %s17_s16 }
   0x4   :  { %s465_s17 = scalar_lea.vmem %s18_s16, 256  ;;  %p470_p1 = scmp.lt.s32.totalorder %s18_s16, %s18_s16 }
   0x5   :  { %p466_p0 = scmp.ne.s32.totalorder %s18_s16, %s465_s17  ;;  %p471_p2 = scmp.lt.s32.totalorder %s465_s17, %s465_s17 }
   0x7   :  { %p472_p3 = por %p471_p2, %p470_p1 }
   0x9   :  { %p473_p4 = pnand %p472_p3, %p466_p0 }
   0xb   :  { %476 = shalt.err (!%p473_p4)
}
   0xc   :  { %s524_s18 = smov 128   ;;  %s525_s19 = smov 8  }
   0xd   :  { %23 = dma.hbm_to_vmem [thread:$0]  %s580_s0, 256, %s18_s16, [#allocation3], %s524_s18, %s524_s18, %s525_s19  }
   0xe   :  { %s526_s22 = smov [#allocation5]  }
   0xf   :  { %s31_s23 = sshll.u32 %s526_s22, 4  ;;  %s32_s23 = int_to_ptr.vmem [resolvable:$true] %s31_s23 }
  0x10   :  { %s485_s24 = scalar_lea.vmem %s32_s23, 8192  ;;  %p490_p6 = scmp.lt.s32.totalorder %s32_s23, %s32_s23 }
  0x11   :  { %p486_p5 = scmp.ne.s32.totalorder %s32_s23, %s485_s24  ;;  %p491_p7 = scmp.lt.s32.totalorder %s485_s24, %s485_s24 }
  0x13   :  { %p492_p8 = por %p491_p7, %p490_p6 }
  0x15   :  { %p493_p9 = pnand %p492_p8, %p486_p5 }
  0x17   :  { %496 = shalt.err (!%p493_p9)
}
  0x18   :  { %s527_s25 = smov 256   ;;  %s528_s26 = smov 16  }
  0x19   :  { %37 = dma.hbm_to_vmem [thread:$0]  %s582_s2, 8192, %s32_s23, [#allocation6], %s527_s25, %s527_s25, %s528_s26  }
  0x1a   :  { %517 = dma.done.wait [#allocation3], 256  }
  0x1b   :  { %518 = vsyncadd [#allocation3], 4294967040 }
  0x1c   :  { %519 = dma.done.wait [#allocation6], 8192  }
  0x1d   :  { %520 = vsyncadd [#allocation6], 4294959104  ;;  %v529_v0 = vmov 0.0   ;;  %v46_v1 = vld [vmem:[#allocation2] sm:$0xff]  ;;  %vm55_vm0 = vcmask 1043456   ;;  %v47_v2 = vld [vmem:[#allocation2 + $0x8] sm:$0xff] }
  0x1e   :  { %124 = vmatprep.mubr.f32.mxu0 %v529_v0  ;;  %201 = vmatprep.mubr.f32.mxu1 %v529_v0  ;;  %v50_v3 = vcombine.high %v46_v1, %v46_v1  ;;  %v132_v4 = vcombine.high %v47_v2, %v47_v2  ;;  %v48_v5 = vld [vmem:[%s581_s1] sm:$0xff]  ;;  %vm51_vm1 = vcmask 31744   ;;  %v239_v6 = vld [vmem:[#allocation5 + $0xf8] sm:$0xff]  ;;  %v237_v8 = vld [vmem:[#allocation5 + $0xe8] sm:$0xff]  ;;  %s530_s6 = smov [#allocation7]  }
  0x1f   :  { %v238_v7 = vld [vmem:[#allocation5 + $0xf0] sm:$0xff]  ;;  %v236_v9 = vld [vmem:[#allocation5 + $0xe0] sm:$0xff]  ;;  %v235_v10 = vld [vmem:[#allocation5 + $0xd8] sm:$0xff]  ;;  %s364_s7 = sshll.u32 %s530_s6, 4  ;;  %s365_s7 = int_to_ptr.vmem [resolvable:$true] %s364_s7 }
  0x20   :  { %377 = vmatprep.subr.msk.mxu0 %vm55_vm0, %v50_v3  ;;  %380 = vmatprep.subr.msk.mxu1 %vm55_vm0, %v132_v4  ;;  %v234_v11 = vld [vmem:[#allocation5 + $0xd0] sm:$0xff]  ;;  %v233_v12 = vld [vmem:[#allocation5 + $0xc8] sm:$0xff]  ;;  %v232_v13 = vld [vmem:[#allocation5 + $0xc0] sm:$0xff]  ;;  %s497_s8 = scalar_lea.vmem %s365_s7, 512  ;;  %p502_p11 = scmp.lt.s32.totalorder %s365_s7, %s365_s7 }
  0x21   :  { %378 = vmatpush1.msk.msra.mxu0 %vm55_vm0, %v46_v1  ;;  %381 = vmatpush1.msk.msra.mxu1 %vm55_vm0, %v47_v2  ;;  %v231_v14 = vld [vmem:[#allocation5 + $0xb8] sm:$0xff]  ;;  %v230_v15 = vld [vmem:[#allocation5 + $0xb0] sm:$0xff]  ;;  %v229_v16 = vld [vmem:[#allocation5 + $0xa8] sm:$0xff]  ;;  %p498_p10 = scmp.ne.s32.totalorder %s365_s7, %s497_s8  ;;  %p503_p12 = scmp.lt.s32.totalorder %s497_s8, %s497_s8 }
  0x22   :  { %379 = vmatmul.mubr.msk.f32.vlgmr.msra.gmra.mxu0 %vm51_vm1, %v48_v5  ;;  %382 = vmatmul.mubr.msk.f32.vlgmr.msra.gmra.mxu1 %vm51_vm1, %v48_v5  ;;  %v228_v17 = vld [vmem:[#allocation5 + $0xa0] sm:$0xff]  ;;  %v227_v18 = vld [vmem:[#allocation5 + $0x98] sm:$0xff]  ;;  %v226_v19 = vld [vmem:[#allocation5 + $0x90] sm:$0xff] }
  0x23   :  { %272 = vmatprep.subr.mxu0 %v239_v6  ;;  %383 = vmatprep.subr.mxu1 %v239_v6  ;;  %v225_v20 = vld [vmem:[#allocation5 + $0x88] sm:$0xff]  ;;  %v224_v21 = vld [vmem:[#allocation5 + $0x80] sm:$0xff]  ;;  %v223_v22 = vld [vmem:[#allocation5 + $0x78] sm:$0xff]  ;;  %p504_p13 = por %p503_p12, %p502_p11 }
  0x24   :  { %273 = vmatpush1.msra.mxu0 %v238_v7  ;;  %415 = vmatpush1.msra.mxu1 %v238_v7  ;;  %v222_v23 = vld [vmem:[#allocation5 + $0x70] sm:$0xff]  ;;  %v221_v24 = vld [vmem:[#allocation5 + $0x68] sm:$0xff]  ;;  %v220_v25 = vld [vmem:[#allocation5 + $0x60] sm:$0xff] }
  0x25   :  { %274 = vmatprep.subr.mxu0 %v237_v8  ;;  %384 = vmatprep.subr.mxu1 %v237_v8  ;;  %v219_v26 = vld [vmem:[#allocation5 + $0x58] sm:$0xff]  ;;  %v218_v27 = vld [vmem:[#allocation5 + $0x50] sm:$0xff]  ;;  %v217_v28 = vld [vmem:[#allocation5 + $0x48] sm:$0xff]  ;;  %p505_p0 = pnand %p504_p13, %p498_p10 }
  0x26   :  { %275 = vmatpush1.msra.mxu0 %v236_v9  ;;  %416 = vmatpush1.msra.mxu1 %v236_v9  ;;  %v216_v29 = vld [vmem:[#allocation5 + $0x40] sm:$0xff]  ;;  %v215_v30 = vld [vmem:[#allocation5 + $0x38] sm:$0xff]  ;;  %v214_v31 = vld [vmem:[#allocation5 + $0x30] sm:$0xff] }
  0x27   :  { %276 = vmatprep.subr.mxu0 %v235_v10  ;;  %385 = vmatprep.subr.mxu1 %v235_v10  ;;  %v213_v32 = vld [vmem:[#allocation5 + $0x28] sm:$0xff]  ;;  %v212_v33 = vld [vmem:[#allocation5 + $0x20] sm:$0xff]  ;;  %v211_v34 = vld [vmem:[#allocation5 + $0x18] sm:$0xff] }
  0x28   :  { %277 = vmatpush1.msra.mxu0 %v234_v11  ;;  %417 = vmatpush1.msra.mxu1 %v234_v11  ;;  %v210_v35 = vld [vmem:[#allocation5 + $0x10] sm:$0xff]  ;;  %v209_v36 = vld [vmem:[#allocation5 + $0x8] sm:$0xff]  ;;  %v208_v37 = vld [vmem:[#allocation5] sm:$0xff] }
  0x29   :  { %278 = vmatprep.subr.mxu0 %v233_v12  ;;  %386 = vmatprep.subr.mxu1 %v233_v12  ;;  %v271_v38 = vld [vmem:[#allocation5 + $0x1f8] sm:$0xff]  ;;  %v270_v39 = vld [vmem:[#allocation5 + $0x1f0] sm:$0xff]  ;;  %v269_v40 = vld [vmem:[#allocation5 + $0x1e8] sm:$0xff] }
  0x2a   :  { %279 = vmatpush1.msra.mxu0 %v232_v13  ;;  %418 = vmatpush1.msra.mxu1 %v232_v13  ;;  %v268_v41 = vld [vmem:[#allocation5 + $0x1e0] sm:$0xff]  ;;  %v267_v42 = vld [vmem:[#allocation5 + $0x1d8] sm:$0xff]  ;;  %v266_v43 = vld [vmem:[#allocation5 + $0x1d0] sm:$0xff] }
  0x2b   :  { %280 = vmatprep.subr.mxu0 %v231_v14  ;;  %387 = vmatprep.subr.mxu1 %v231_v14  ;;  %v265_v44 = vld [vmem:[#allocation5 + $0x1c8] sm:$0xff]  ;;  %v264_v45 = vld [vmem:[#allocation5 + $0x1c0] sm:$0xff]  ;;  %v263_v46 = vld [vmem:[#allocation5 + $0x1b8] sm:$0xff] }
  0x2c   :  { %281 = vmatpush1.msra.mxu0 %v230_v15  ;;  %419 = vmatpush1.msra.mxu1 %v230_v15  ;;  %v262_v47 = vld [vmem:[#allocation5 + $0x1b0] sm:$0xff]  ;;  %v261_v48 = vld [vmem:[#allocation5 + $0x1a8] sm:$0xff]  ;;  %v260_v49 = vld [vmem:[#allocation5 + $0x1a0] sm:$0xff] }
  0x2d   :  { %282 = vmatprep.subr.mxu0 %v229_v16  ;;  %388 = vmatprep.subr.mxu1 %v229_v16  ;;  %v259_v50 = vld [vmem:[#allocation5 + $0x198] sm:$0xff]  ;;  %v258_v51 = vld [vmem:[#allocation5 + $0x190] sm:$0xff]  ;;  %v257_v52 = vld [vmem:[#allocation5 + $0x188] sm:$0xff] }
  0x2e   :  { %283 = vmatpush1.msra.mxu0 %v228_v17  ;;  %420 = vmatpush1.msra.mxu1 %v228_v17  ;;  %v256_v53 = vld [vmem:[#allocation5 + $0x180] sm:$0xff]  ;;  %v255_v54 = vld [vmem:[#allocation5 + $0x178] sm:$0xff]  ;;  %v254_v55 = vld [vmem:[#allocation5 + $0x170] sm:$0xff] }
  0x2f   :  { %284 = vmatprep.subr.mxu0 %v227_v18  ;;  %389 = vmatprep.subr.mxu1 %v227_v18  ;;  %v253_v56 = vld [vmem:[#allocation5 + $0x168] sm:$0xff]  ;;  %v252_v57 = vld [vmem:[#allocation5 + $0x160] sm:$0xff]  ;;  %v251_v58 = vld [vmem:[#allocation5 + $0x158] sm:$0xff] }
  0x30   :  { %285 = vmatpush1.msra.mxu0 %v226_v19  ;;  %421 = vmatpush1.msra.mxu1 %v226_v19  ;;  %v250_v59 = vld [vmem:[#allocation5 + $0x150] sm:$0xff]  ;;  %v249_v60 = vld [vmem:[#allocation5 + $0x148] sm:$0xff]  ;;  %v248_v61 = vld [vmem:[#allocation5 + $0x140] sm:$0xff] }
  0x31   :  { %286 = vmatprep.subr.mxu0 %v225_v20  ;;  %390 = vmatprep.subr.mxu1 %v225_v20  ;;  %v247_v62 = vld [vmem:[#allocation5 + $0x138] sm:$0xff]  ;;  %v246_v63 = vld [vmem:[#allocation5 + $0x130] sm:$0xff]  ;;  %v245_v0 = vld [vmem:[#allocation5 + $0x128] sm:$0xff] }
  0x32   :  { %287 = vmatpush1.msra.mxu0 %v224_v21  ;;  %422 = vmatpush1.msra.mxu1 %v224_v21  ;;  %v244_v1 = vld [vmem:[#allocation5 + $0x120] sm:$0xff]  ;;  %v243_v2 = vld [vmem:[#allocation5 + $0x118] sm:$0xff]  ;;  %v242_v3 = vld [vmem:[#allocation5 + $0x110] sm:$0xff] }
  0x33   :  { %288 = vmatprep.subr.mxu0 %v223_v22  ;;  %391 = vmatprep.subr.mxu1 %v223_v22  ;;  %v241_v4 = vld [vmem:[#allocation5 + $0x108] sm:$0xff]  ;;  %v240_v5 = vld [vmem:[#allocation5 + $0x100] sm:$0xff]  ;;  %v349_v10 = vld [vmem:[%s583_s3] sm:$0xff] }
  0x34   :  { %289 = vmatpush1.msra.mxu0 %v222_v23  ;;  %423 = vmatpush1.msra.mxu1 %v222_v23  ;;  %v350_v13 = vld [vmem:[%s583_s3 + $0x8] sm:$0xff] }
  0x35   :  { %290 = vmatprep.subr.mxu0 %v221_v24  ;;  %392 = vmatprep.subr.mxu1 %v221_v24 }
  0x36   :  { %291 = vmatpush1.msra.mxu0 %v220_v25  ;;  %424 = vmatpush1.msra.mxu1 %v220_v25 }
  0x37   :  { %292 = vmatprep.subr.mxu0 %v219_v26  ;;  %393 = vmatprep.subr.mxu1 %v219_v26 }
  0x38   :  { %293 = vmatpush1.msra.mxu0 %v218_v27  ;;  %425 = vmatpush1.msra.mxu1 %v218_v27 }
  0x39   :  { %294 = vmatprep.subr.mxu0 %v217_v28  ;;  %394 = vmatprep.subr.mxu1 %v217_v28 }
  0x3a   :  { %295 = vmatpush1.msra.mxu0 %v216_v29  ;;  %426 = vmatpush1.msra.mxu1 %v216_v29 }
  0x3b   :  { %296 = vmatprep.subr.mxu0 %v215_v30  ;;  %395 = vmatprep.subr.mxu1 %v215_v30 }
  0x3c   :  { %297 = vmatpush1.msra.mxu0 %v214_v31  ;;  %427 = vmatpush1.msra.mxu1 %v214_v31 }
  0x3d   :  { %298 = vmatprep.subr.mxu0 %v213_v32  ;;  %396 = vmatprep.subr.mxu1 %v213_v32 }
  0x3e   :  { %299 = vmatpush1.msra.mxu0 %v212_v33  ;;  %428 = vmatpush1.msra.mxu1 %v212_v33 }
  0x3f   :  { %300 = vmatprep.subr.mxu0 %v211_v34  ;;  %397 = vmatprep.subr.mxu1 %v211_v34 }
  0x40   :  { %301 = vmatpush1.msra.mxu0 %v210_v35  ;;  %429 = vmatpush1.msra.mxu1 %v210_v35 }
  0x41   :  { %302 = vmatprep.subr.mxu0 %v209_v36  ;;  %398 = vmatprep.subr.mxu1 %v209_v36 }
  0x42   :  { %303 = vmatpush1.msra.mxu0 %v208_v37  ;;  %430 = vmatpush1.msra.mxu1 %v208_v37 }
  0x43   :  { %304 = vmatprep.subr.mxu0 %v271_v38  ;;  %399 = vmatprep.subr.mxu1 %v271_v38 }
  0x44   :  { %305 = vmatpush2.msra.mxu0 %v270_v39  ;;  %431 = vmatpush2.msra.mxu1 %v270_v39 }
  0x45   :  { %306 = vmatprep.subr.mxu0 %v269_v40  ;;  %400 = vmatprep.subr.mxu1 %v269_v40 }
  0x46   :  { %307 = vmatpush2.msra.mxu0 %v268_v41  ;;  %432 = vmatpush2.msra.mxu1 %v268_v41 }
  0x47   :  { %308 = vmatprep.subr.mxu0 %v267_v42  ;;  %401 = vmatprep.subr.mxu1 %v267_v42 }
  0x48   :  { %309 = vmatpush2.msra.mxu0 %v266_v43  ;;  %433 = vmatpush2.msra.mxu1 %v266_v43 }
  0x49   :  { %310 = vmatprep.subr.mxu0 %v265_v44  ;;  %402 = vmatprep.subr.mxu1 %v265_v44 }
  0x4a   :  { %311 = vmatpush2.msra.mxu0 %v264_v45  ;;  %434 = vmatpush2.msra.mxu1 %v264_v45 }
  0x4b   :  { %312 = vmatprep.subr.mxu0 %v263_v46  ;;  %403 = vmatprep.subr.mxu1 %v263_v46 }
  0x4c   :  { %313 = vmatpush2.msra.mxu0 %v262_v47  ;;  %435 = vmatpush2.msra.mxu1 %v262_v47 }
  0x4d   :  { %314 = vmatprep.subr.mxu0 %v261_v48  ;;  %404 = vmatprep.subr.mxu1 %v261_v48 }
  0x4e   :  { %315 = vmatpush2.msra.mxu0 %v260_v49  ;;  %436 = vmatpush2.msra.mxu1 %v260_v49 }
  0x4f   :  { %316 = vmatprep.subr.mxu0 %v259_v50  ;;  %405 = vmatprep.subr.mxu1 %v259_v50 }
  0x50   :  { %317 = vmatpush2.msra.mxu0 %v258_v51  ;;  %437 = vmatpush2.msra.mxu1 %v258_v51 }
  0x51   :  { %318 = vmatprep.subr.mxu0 %v257_v52  ;;  %406 = vmatprep.subr.mxu1 %v257_v52 }
  0x52   :  { %319 = vmatpush2.msra.mxu0 %v256_v53  ;;  %438 = vmatpush2.msra.mxu1 %v256_v53 }
  0x53   :  { %320 = vmatprep.subr.mxu0 %v255_v54  ;;  %407 = vmatprep.subr.mxu1 %v255_v54 }
  0x54   :  { %321 = vmatpush2.msra.mxu0 %v254_v55  ;;  %439 = vmatpush2.msra.mxu1 %v254_v55 }
  0x55   :  { %322 = vmatprep.subr.mxu0 %v253_v56  ;;  %408 = vmatprep.subr.mxu1 %v253_v56 }
  0x56   :  { %323 = vmatpush2.msra.mxu0 %v252_v57  ;;  %440 = vmatpush2.msra.mxu1 %v252_v57 }
  0x57   :  { %324 = vmatprep.subr.mxu0 %v251_v58  ;;  %409 = vmatprep.subr.mxu1 %v251_v58 }
  0x58   :  { %325 = vmatpush2.msra.mxu0 %v250_v59  ;;  %441 = vmatpush2.msra.mxu1 %v250_v59 }
  0x59   :  { %326 = vmatprep.subr.mxu0 %v249_v60  ;;  %410 = vmatprep.subr.mxu1 %v249_v60 }
  0x5a   :  { %327 = vmatpush2.msra.mxu0 %v248_v61  ;;  %442 = vmatpush2.msra.mxu1 %v248_v61 }
  0x5b   :  { %328 = vmatprep.subr.mxu0 %v247_v62  ;;  %411 = vmatprep.subr.mxu1 %v247_v62 }
  0x5c   :  { %329 = vmatpush2.msra.mxu0 %v246_v63  ;;  %443 = vmatpush2.msra.mxu1 %v246_v63 }
  0x5d   :  { %330 = vmatprep.subr.mxu0 %v245_v0  ;;  %412 = vmatprep.subr.mxu1 %v245_v0 }
  0x5e   :  { %331 = vmatpush2.msra.mxu0 %v244_v1  ;;  %444 = vmatpush2.msra.mxu1 %v244_v1 }
  0x5f   :  { %332 = vmatprep.subr.mxu0 %v243_v2  ;;  %413 = vmatprep.subr.mxu1 %v243_v2 }
  0x60   :  { %333 = vmatpush2.msra.mxu0 %v242_v3  ;;  %445 = vmatpush2.msra.mxu1 %v242_v3 }
  0x61   :  { %334 = vmatprep.subr.mxu0 %v241_v4  ;;  %414 = vmatprep.subr.mxu1 %v241_v4 }
  0x62   :  { %335 = vmatpush2.msra.mxu0 %v240_v5  ;;  %446 = vmatpush2.msra.mxu1 %v240_v5 }
  0xe2   :  { %v126_v6 = vpop.f32.mrf.mxu0  ;;  %v203_v7 = vpop.f32.mrf.mxu1 }
  0xe4   :  { %v128_v8 = vpop.f32.mrf.mxu0  ;;  %v205_v9 = vpop.f32.mrf.mxu1 }
  0xe5   :  { %336 = vmatprep.mubr.f32.mxu0 %v128_v8  ;;  %342 = vmatprep.mubr.f32.mxu1 %v205_v9 }
  0xe6   :  { %337 = vmatmul.mubr.f32.vlgmr.msra.gmra.mxu0 %v126_v6  ;;  %343 = vmatmul.mubr.f32.vlgmr.msra.gmra.mxu1 %v203_v7 }
 0x1a6   :  { %v338_v11 = vpop.f32.mrf.mxu0  ;;  %v344_v12 = vpop.f32.mrf.mxu1 }
 0x1a7   :  { %v351_v14 = vadd.f32 %v349_v10, %v338_v11  ;;  %v353_v15 = vadd.f32 %v349_v10, %v344_v12 }
 0x1a8   :  { %v340_v16 = vpop.f32.mrf.mxu0  ;;  %v346_v17 = vpop.f32.mrf.mxu1 }
 0x1a9   :  { %355 = vst [vmem:[#allocation7] sm:$0xff] %v351_v14  ;;  %357 = vst [vmem:[#allocation7 + $0x10] sm:$0xff] %v353_v15  ;;  %v352_v18 = vadd.f32 %v350_v13, %v340_v16  ;;  %v354_v19 = vadd.f32 %v350_v13, %v346_v17 }
 0x1ab   :  { %356 = vst [vmem:[#allocation7 + $0x8] sm:$0xff] %v352_v18  ;;  %358 = vst [vmem:[#allocation7 + $0x18] sm:$0xff] %v354_v19 }
 0x1ac   :  { %508 = shalt.err (!%p505_p0)
}
 0x1ad   :  { %370 = dma.vmem_to_hbm [thread:$0]  %s365_s7, 512, %s584_s4, [#allocation4], %s527_s25, %s527_s25, %s528_s26  }
 0x1ae   :  { %521 = dma.done.wait [#allocation4], 512  }
 0x1af   :  { %522 = vsyncadd [#allocation4], 4294966784 }
 0x1b0   :  { %374 = vsyncpa [#allocation3], 1 }
 0x1b1   :  { %375 = vsyncpa [#allocation6], 1 }
 0x1b2   :  { %376 = vsyncpa [#allocation4], 1 }

</bundles_post_ra>
